<compile_context>
chip_gen: v7x
topology: tpu7x:2x2x1
jax: 0.10.0
libtpu: 0.0.40
codegen_flags: <defaults>
</compile_context>

<pallas_src>
import functools

import jax
import jax.numpy as jnp
from jax.experimental import pallas as pl
from jax.experimental.pallas import tpu as pltpu

KH = KW = 4
PAD = 1
BN_EPS = 1e-5
LRELU_SLOPE = 0.2
LANE = 128


def _round_up(x, m):
    return (x + m - 1) // m * m


def _vmem_plan():
    """(scoped vmem limit, per-step block budget) derived from the local TPU."""
    try:
        cap = int(pltpu.get_tpu_info().vmem_capacity_bytes)
    except Exception:
        cap = 64 * 1024 * 1024            # conservative: v7x per-TC VMEM
    limit = min((cap * 3) // 4, 96 * 1024 * 1024)   # 48 MiB on v7x, 96 MiB on v5e/v6e
    budget = max(limit - 8 * 1024 * 1024, 16 * 1024 * 1024)  # compiler-scratch headroom
    return limit, budget


def _pick_row_tile(oh, ow, s, khs, cin4, cout_p, n_batch, budget):
    """Output-row tile for the conv kernel, chosen from a VMEM byte budget."""
    def step_bytes(toh):
        tohh = toh + khs - 1
        return (2 * s * tohh * ow * cin4 * 2          # input block, double-buffered bf16
                + 2 * (s * khs) * cin4 * cout_p * 2   # weights (counted double-buffered)
                + 2 * toh * ow * cout_p * 2           # y block, double-buffered bf16
                + 2 * 2 * cout_p * 4                  # stats blocks
                + 2 * toh * ow * cout_p * 4)          # f32 scratch acc + dot temporary
    divs = [t for t in range(1, oh + 1) if oh % t == 0]
    ok = [t for t in divs
          if step_bytes(t) <= budget and ((t * ow) % 8 == 0 or t == oh)]
    if not ok:
        ok = [t for t in divs if step_bytes(t) <= budget] or divs[:1]
    capped = [t for t in ok if t * ow <= 4096] or ok[:1]   # keep a few pipeline steps
    toh = max(capped)
    # v7x has 2 TensorCores: with batch==1 prefer >=2 grid steps so both get work.
    if n_batch == 1 and oh // toh < 2:
        split = [t for t in capped if oh // t >= 2]
        if split:
            toh = max(split)
    return toh


def _pick_col_tile(mw, cout, cout_p, budget):
    """Spatial tile (lane axis of the transposed output) for the epilogue kernel."""
    def step_bytes(t):
        return (2 * t * cout_p * 2      # y blocks (double-buffered bf16)
                + 2 * cout * t * 4      # out blocks (double-buffered f32)
                + 2 * t * cout_p * 4    # in-kernel f32 value + transpose temporary
                + 4 * cout_p * 4)
    divs = [t for t in range(1, mw + 1) if mw % t == 0]
    pref = [t for t in divs if t % LANE == 0 and t <= 8192 and step_bytes(t) <= budget]
    if pref:
        return max(pref)                # lane-dense (multiple of 128)
    if step_bytes(mw) <= budget:
        return mw                       # full extent is always layout-legal
    ok = [t for t in divs if step_bytes(t) <= budget]
    return max(ok) if ok else 1


def _reflect(idx, size):
    """Reflect-pad index mapping (pad width 1): -1 -> 1, size -> size-2."""
    idx = jnp.where(idx < 0, -idx, idx)
    return jnp.where(idx >= size, 2 * size - 2 - idx, idx)


# ---------------------------------------------------------------------------
# Kernel 1: conv as 4 row-phase bf16 MXU matmuls with K = 4*Cin (kw folded in),
#           f32 accumulation in a VMEM scratch, plus per-tile BN partial sums
#           written to independent outputs so the whole grid is "parallel".
# ---------------------------------------------------------------------------
def _conv_stats_kernel(x_ref, w_ref, y_ref, sum_ref, ssq_ref, acc_ref, *,
                       s, khs, toh, ow):
    # x_ref:   (s, (toh+khs-1)*ow, 4*cin)  bf16  row-phase rows (+halo), kw in K
    # w_ref:   (s*khs, 4*cin, cout_p)      bf16  resident per-row-phase weights
    # y_ref:   (toh*ow, cout_p)            bf16  conv output rows for this tile
    # sum_ref, ssq_ref: (1, cout_p)        f32   per-tile BN partial statistics
    # acc_ref: (toh*ow, cout_p)            f32   scratch accumulator
    first = True
    for r in range(s):
        for v in range(khs):
            lhs = x_ref[r, v * ow:(v + toh) * ow, :]
            rhs = w_ref[r * khs + v, :, :]
            part = jnp.dot(lhs, rhs, preferred_element_type=jnp.float32)
            if first:
                acc_ref[...] = part          # no zero-init pass
                first = False
            else:
                acc_ref[...] += part
    acc = acc_ref[...]
    y_ref[...] = acc.astype(y_ref.dtype)
    sum_ref[...] = jnp.sum(acc, axis=0, keepdims=True)
    ssq_ref[...] = jnp.sum(acc * acc, axis=0, keepdims=True)


# ---------------------------------------------------------------------------
# Kernel 2: fused BN-affine + LeakyReLU(0.2) + channel slice + NHWC->NCHW
#           transpose (epilogue is HBM-bound; the XLU transpose rides for free).
# ---------------------------------------------------------------------------
def _bn_lrelu_kernel(y_ref, scale_ref, shift_ref, o_ref, *, cout):
    z = y_ref[...].astype(jnp.float32) * scale_ref[...] + shift_ref[...]
    z = jnp.where(z >= 0, z, LRELU_SLOPE * z)
    o_ref[...] = z.T[:cout, :]


@functools.partial(jax.jit, static_argnames=("stride",))
def cnn_block(x, weight, gamma, beta, *, stride):
    """CNNBlock forward. x: (N, Cin, H, W) NCHW; weight: (Cout, Cin, 4, 4)."""
    if KH % stride != 0:
        raise NotImplementedError("stride must divide the 4x4 kernel (1, 2 or 4)")
    n, cin, h, w_in = x.shape
    cout = weight.shape[0]
    s = stride
    khs = KH // s
    oh = (h + 2 * PAD - KH) // s + 1
    ow = (w_in + 2 * PAD - KW) // s + 1
    cin4 = KW * cin                       # folded contraction depth (always 4*Cin)
    cout_p = _round_up(cout, LANE)

    vmem_limit, budget = _vmem_plan()
    toh = _pick_row_tile(oh, ow, s, khs, cin4, cout_p, n, budget)
    nb = oh // toh
    tohh = toh + khs - 1                  # +halo rows for the v shift

    # ---- prep: two bf16 HBM passes.
    # Pass 1: cast + NCHW -> NHWC.
    x_nhwc = jnp.transpose(x.astype(jnp.bfloat16), (0, 2, 3, 1))      # (N,H,W,Cin)
    # Pass 2: one gather that fuses reflect-pad, the stride/row-phase split, the
    # kw unfolding and the per-tile halo duplication into the kernel input layout
    #   xin[n, j, r, i*ow+oj, kw*Cin+ci] = x_pad[n, s*(j*toh+i)+r, s*oj+kw, ci].
    j_ar = jnp.arange(nb)[:, None, None]
    r_ar = jnp.arange(s)[None, :, None]
    i_ar = jnp.arange(tohh)[None, None, :]
    row_src = _reflect(s * (j_ar * toh + i_ar) + r_ar - PAD, h)       # (nb,s,tohh)
    col_src = _reflect(s * jnp.arange(ow)[:, None] + jnp.arange(KW)[None, :] - PAD,
                       w_in)                                          # (ow,KW)
    gathered = x_nhwc[:, row_src[:, :, :, None, None],
                      col_src[None, None, None, :, :], :]             # (N,nb,s,tohh,ow,KW,Cin)
    xin = gathered.reshape(n, nb, s, tohh * ow, cin4)

    # Weights: (Cout,Cin,KH,KW) -> (s*khs row-phases, KW*Cin, Cout_pad), bf16.
    wt = weight.reshape(cout, cin, khs, s, KW).transpose(3, 2, 4, 1, 0)
    wt = wt.reshape(s * khs, cin4, cout)
    wt = jnp.pad(wt, ((0, 0), (0, 0), (0, cout_p - cout))).astype(jnp.bfloat16)

    m = n * oh * ow
    cost = pl.CostEstimate(
        flops=2 * m * KH * KW * cin * cout_p,
        transcendentals=0,
        bytes_accessed=xin.size * 2 + wt.size * 2 + m * cout_p * 2
        + 2 * n * nb * cout_p * 4,
    )

    y, sum_p, ssq_p = pl.pallas_call(
        functools.partial(_conv_stats_kernel, s=s, khs=khs, toh=toh, ow=ow),
        out_shape=(
            jax.ShapeDtypeStruct((n, oh * ow, cout_p), jnp.bfloat16),
            jax.ShapeDtypeStruct((n, nb, 1, cout_p), jnp.float32),
            jax.ShapeDtypeStruct((n, nb, 1, cout_p), jnp.float32),
        ),
        grid_spec=pltpu.PrefetchScalarGridSpec(
            num_scalar_prefetch=0,
            grid=(n, nb),
            in_specs=[
                pl.BlockSpec((None, None, s, tohh * ow, cin4),
                             lambda i, j: (i, j, 0, 0, 0)),
                # Resident weights (constant index map -> DMA'd once).
                pl.BlockSpec((s * khs, cin4, cout_p), lambda i, j: (0, 0, 0)),
            ],
            out_specs=[
                pl.BlockSpec((None, toh * ow, cout_p), lambda i, j: (i, j, 0)),
                pl.BlockSpec((None, None, 1, cout_p), lambda i, j: (i, j, 0, 0)),
                pl.BlockSpec((None, None, 1, cout_p), lambda i, j: (i, j, 0, 0)),
            ],
            scratch_shapes=[pltpu.VMEM((toh * ow, cout_p), jnp.float32)],
        ),
        compiler_params=pltpu.CompilerParams(
            dimension_semantics=("parallel", "parallel"),
            vmem_limit_bytes=vmem_limit,
        ),
        cost_estimate=cost,
    )(xin, wt)

    # Training-mode BatchNorm statistics from the f32 per-tile partial sums.
    sum_c = jnp.sum(sum_p, axis=(0, 1, 2))                  # (Cout_pad,)
    ssq_c = jnp.sum(ssq_p, axis=(0, 1, 2))
    mean = sum_c / m
    var = jnp.maximum(ssq_c / m - mean * mean, 0.0)         # guard cancellation
    gamma_p = jnp.pad(gamma.astype(jnp.float32), (0, cout_p - cout))
    beta_p = jnp.pad(beta.astype(jnp.float32), (0, cout_p - cout))
    scale = (gamma_p * jax.lax.rsqrt(var + BN_EPS)).reshape(1, cout_p)
    shift = (beta_p - mean * scale[0]).reshape(1, cout_p)

    # Fused BN + LeakyReLU + slice + transpose epilogue -> (N, Cout, OH*OW) f32.
    mw = oh * ow
    tm2 = _pick_col_tile(mw, cout, cout_p, budget)
    out = pl.pallas_call(
        functools.partial(_bn_lrelu_kernel, cout=cout),
        out_shape=jax.ShapeDtypeStruct((n, cout, mw), jnp.float32),
        grid_spec=pltpu.PrefetchScalarGridSpec(
            num_scalar_prefetch=0,
            grid=(n, mw // tm2),
            in_specs=[
                pl.BlockSpec((None, tm2, cout_p), lambda b, i: (b, i, 0)),
                pl.BlockSpec((1, cout_p), lambda b, i: (0, 0)),
                pl.BlockSpec((1, cout_p), lambda b, i: (0, 0)),
            ],
            out_specs=pl.BlockSpec((None, cout, tm2), lambda b, i: (b, 0, i)),
        ),
        compiler_params=pltpu.CompilerParams(
            dimension_semantics=("parallel", "parallel"),
            vmem_limit_bytes=vmem_limit,
        ),
    )(y, scale, shift)

    # Contiguous reshape only (no XLA transpose pass): (N, Cout, OH, OW).
    return out.reshape(n, cout, oh, ow)


def _reference(x, weight, gamma, beta, stride):
    """Pure-JAX reference: reflect-pad conv + training-mode BN + LeakyReLU."""
    xp = jnp.pad(x, ((0, 0), (0, 0), (PAD, PAD), (PAD, PAD)), mode="reflect")
    y = jax.lax.conv_general_dilated(
        xp, weight, window_strides=(stride, stride), padding="VALID",
        dimension_numbers=("NCHW", "OIHW", "NCHW"))
    mean = jnp.mean(y, axis=(0, 2, 3), keepdims=True)
    var = jnp.mean((y - mean) ** 2, axis=(0, 2, 3), keepdims=True)
    z = (y - mean) * jax.lax.rsqrt(var + BN_EPS)
    z = z * gamma[None, :, None, None] + beta[None, :, None, None]
    return jnp.where(z >= 0, z, LRELU_SLOPE * z)


if __name__ == "__main__":
    # Small deterministic example: N=2, Cin=4, H=W=16, Cout=8, stride=2 -> 8x8 out.
    key = jax.random.PRNGKey(0)
    k_x, k_w, k_g, k_b = jax.random.split(key, 4)

    N, CIN, H, W = 2, 4, 16, 16
    COUT, STRIDE = 8, 2

    x = jax.random.normal(k_x, (N, CIN, H, W), dtype=jnp.float32)
    weight = 0.1 * jax.random.normal(k_w, (COUT, CIN, KH, KW), dtype=jnp.float32)
    gamma = 1.0 + 0.1 * jax.random.normal(k_g, (COUT,), dtype=jnp.float32)
    beta = 0.1 * jax.random.normal(k_b, (COUT,), dtype=jnp.float32)

    out = cnn_block(x, weight, gamma, beta, stride=STRIDE)
    out = jax.block_until_ready(out)

    assert out.shape == (N, COUT, H // STRIDE, W // STRIDE), out.shape
    assert bool(jnp.all(jnp.isfinite(out)))
    # Loose tolerance: kernel uses bf16 operands with f32 accumulation.
    ref = _reference(x, weight, gamma, beta, STRIDE)
    assert float(jnp.max(jnp.abs(out - ref))) < 0.1
    print("KERNEL_OK")
</pallas_src>

<mosaic_0001>
module attributes {stable_mosaic.version = 11 : i64} {
  func.func @_conv_stats_kernel(%arg0: i32, %arg1: i32, %arg2: memref<1x1x2x72x16xbf16, #tpu.memory_space<vmem>>, %arg3: memref<4x16x128xbf16, #tpu.memory_space<vmem>>, %arg4: memref<1x64x128xbf16, #tpu.memory_space<vmem>>, %arg5: memref<1x1x1x128xf32, #tpu.memory_space<vmem>>, %arg6: memref<1x1x1x128xf32, #tpu.memory_space<vmem>>, %arg7: memref<64x128xf32, #tpu.memory_space<vmem>>) attributes {dimension_semantics = [#tpu.dimension_semantics<parallel>, #tpu.dimension_semantics<parallel>], iteration_bounds = array<i64: 2, 1>, scalar_prefetch = 0 : i64, scratch_operands = 1 : i64, tpu.core_type = #tpu.core_type<tc>, window_params = [{transform_indices = @transform_0, window_bounds = array<i64: 1, 1, 2, 72, 16>}, {pipeline_mode = #tpu.pipeline_mode<synchronous>, transform_indices = @transform_1, window_bounds = array<i64: 4, 16, 128>}, {transform_indices = @transform_2, window_bounds = array<i64: 1, 64, 128>}, {transform_indices = @transform_3, window_bounds = array<i64: 1, 1, 1, 128>}, {transform_indices = @transform_4, window_bounds = array<i64: 1, 1, 1, 128>}]} {
    %c0 = arith.constant 0 : index
    %c0_0 = arith.constant 0 : index
    %c0_1 = arith.constant 0 : index
    %c0_2 = arith.constant 0 : index
    %c0_3 = arith.constant 0 : index
    %0 = vector.load %arg2[%c0, %c0_0, %c0_1, %c0_2, %c0_3] : memref<1x1x2x72x16xbf16, #tpu.memory_space<vmem>>, vector<1x1x1x64x16xbf16>
    %1 = vector.shape_cast %0 : vector<1x1x1x64x16xbf16> to vector<64x16xbf16>
    %c0_4 = arith.constant 0 : index
    %c0_5 = arith.constant 0 : index
    %c0_6 = arith.constant 0 : index
    %2 = vector.load %arg3[%c0_4, %c0_5, %c0_6] : memref<4x16x128xbf16, #tpu.memory_space<vmem>>, vector<1x16x128xbf16>
    %3 = vector.shape_cast %2 : vector<1x16x128xbf16> to vector<16x128xbf16>
    %cst = arith.constant dense<0.000000e+00> : vector<64x128xf32>
    %4 = tpu.matmul %1, %3, %cst {dimension_numbers = #tpu.dot_dimension_numbers<[1], [0], [0], [1], [0, 0, 1, 1], [], []>} : vector<64x16xbf16>, vector<16x128xbf16>, vector<64x128xf32> -> vector<64x128xf32>
    %c0_7 = arith.constant 0 : index
    %c0_8 = arith.constant 0 : index
    %5 = vector.load %arg7[%c0_7, %c0_8] : memref<64x128xf32, #tpu.memory_space<vmem>>, vector<64x128xf32>
    tpu.vector_store %arg7[%c0_7, %c0_8], %4 {strides = array<i32>} : memref<64x128xf32, #tpu.memory_space<vmem>>, vector<64x128xf32>,
    %c0_9 = arith.constant 0 : index
    %c0_10 = arith.constant 0 : index
    %c0_11 = arith.constant 0 : index
    %c8 = arith.constant 8 : index
    %c0_12 = arith.constant 0 : index
    %6 = vector.load %arg2[%c0_9, %c0_10, %c0_11, %c8, %c0_12] : memref<1x1x2x72x16xbf16, #tpu.memory_space<vmem>>, vector<1x1x1x64x16xbf16>
    %7 = vector.shape_cast %6 : vector<1x1x1x64x16xbf16> to vector<64x16xbf16>
    %c1 = arith.constant 1 : index
    %c0_13 = arith.constant 0 : index
    %c0_14 = arith.constant 0 : index
    %8 = vector.load %arg3[%c1, %c0_13, %c0_14] : memref<4x16x128xbf16, #tpu.memory_space<vmem>>, vector<1x16x128xbf16>
    %9 = vector.shape_cast %8 : vector<1x16x128xbf16> to vector<16x128xbf16>
    %cst_15 = arith.constant dense<0.000000e+00> : vector<64x128xf32>
    %10 = tpu.matmul %7, %9, %cst_15 {dimension_numbers = #tpu.dot_dimension_numbers<[1], [0], [0], [1], [0, 0, 1, 1], [], []>} : vector<64x16xbf16>, vector<16x128xbf16>, vector<64x128xf32> -> vector<64x128xf32>
    %c0_16 = arith.constant 0 : index
    %c0_17 = arith.constant 0 : index
    %11 = vector.load %arg7[%c0_16, %c0_17] : memref<64x128xf32, #tpu.memory_space<vmem>>, vector<64x128xf32>
    %12 = arith.addf %11, %10 : vector<64x128xf32>
    %c0_18 = arith.constant 0 : index
    %c0_19 = arith.constant 0 : index
    %13 = vector.load %arg7[%c0_18, %c0_19] : memref<64x128xf32, #tpu.memory_space<vmem>>, vector<64x128xf32>
    tpu.vector_store %arg7[%c0_18, %c0_19], %12 {strides = array<i32>} : memref<64x128xf32, #tpu.memory_space<vmem>>, vector<64x128xf32>,
    %c0_20 = arith.constant 0 : index
    %c0_21 = arith.constant 0 : index
    %c1_22 = arith.constant 1 : index
    %c0_23 = arith.constant 0 : index
    %c0_24 = arith.constant 0 : index
    %14 = vector.load %arg2[%c0_20, %c0_21, %c1_22, %c0_23, %c0_24] : memref<1x1x2x72x16xbf16, #tpu.memory_space<vmem>>, vector<1x1x1x64x16xbf16>
    %15 = vector.shape_cast %14 : vector<1x1x1x64x16xbf16> to vector<64x16xbf16>
    %c2 = arith.constant 2 : index
    %c0_25 = arith.constant 0 : index
    %c0_26 = arith.constant 0 : index
    %16 = vector.load %arg3[%c2, %c0_25, %c0_26] : memref<4x16x128xbf16, #tpu.memory_space<vmem>>, vector<1x16x128xbf16>
    %17 = vector.shape_cast %16 : vector<1x16x128xbf16> to vector<16x128xbf16>
    %cst_27 = arith.constant dense<0.000000e+00> : vector<64x128xf32>
    %18 = tpu.matmul %15, %17, %cst_27 {dimension_numbers = #tpu.dot_dimension_numbers<[1], [0], [0], [1], [0, 0, 1, 1], [], []>} : vector<64x16xbf16>, vector<16x128xbf16>, vector<64x128xf32> -> vector<64x128xf32>
    %c0_28 = arith.constant 0 : index
    %c0_29 = arith.constant 0 : index
    %19 = vector.load %arg7[%c0_28, %c0_29] : memref<64x128xf32, #tpu.memory_space<vmem>>, vector<64x128xf32>
    %20 = arith.addf %19, %18 : vector<64x128xf32>
    %c0_30 = arith.constant 0 : index
    %c0_31 = arith.constant 0 : index
    %21 = vector.load %arg7[%c0_30, %c0_31] : memref<64x128xf32, #tpu.memory_space<vmem>>, vector<64x128xf32>
    tpu.vector_store %arg7[%c0_30, %c0_31], %20 {strides = array<i32>} : memref<64x128xf32, #tpu.memory_space<vmem>>, vector<64x128xf32>,
    %c0_32 = arith.constant 0 : index
    %c0_33 = arith.constant 0 : index
    %c1_34 = arith.constant 1 : index
    %c8_35 = arith.constant 8 : index
    %c0_36 = arith.constant 0 : index
    %22 = vector.load %arg2[%c0_32, %c0_33, %c1_34, %c8_35, %c0_36] : memref<1x1x2x72x16xbf16, #tpu.memory_space<vmem>>, vector<1x1x1x64x16xbf16>
    %23 = vector.shape_cast %22 : vector<1x1x1x64x16xbf16> to vector<64x16xbf16>
    %c3 = arith.constant 3 : index
    %c0_37 = arith.constant 0 : index
    %c0_38 = arith.constant 0 : index
    %24 = vector.load %arg3[%c3, %c0_37, %c0_38] : memref<4x16x128xbf16, #tpu.memory_space<vmem>>, vector<1x16x128xbf16>
    %25 = vector.shape_cast %24 : vector<1x16x128xbf16> to vector<16x128xbf16>
    %cst_39 = arith.constant dense<0.000000e+00> : vector<64x128xf32>
    %26 = tpu.matmul %23, %25, %cst_39 {dimension_numbers = #tpu.dot_dimension_numbers<[1], [0], [0], [1], [0, 0, 1, 1], [], []>} : vector<64x16xbf16>, vector<16x128xbf16>, vector<64x128xf32> -> vector<64x128xf32>
    %c0_40 = arith.constant 0 : index
    %c0_41 = arith.constant 0 : index
    %27 = vector.load %arg7[%c0_40, %c0_41] : memref<64x128xf32, #tpu.memory_space<vmem>>, vector<64x128xf32>
    %28 = arith.addf %27, %26 : vector<64x128xf32>
    %c0_42 = arith.constant 0 : index
    %c0_43 = arith.constant 0 : index
    %29 = vector.load %arg7[%c0_42, %c0_43] : memref<64x128xf32, #tpu.memory_space<vmem>>, vector<64x128xf32>
    tpu.vector_store %arg7[%c0_42, %c0_43], %28 {strides = array<i32>} : memref<64x128xf32, #tpu.memory_space<vmem>>, vector<64x128xf32>,
    %c0_44 = arith.constant 0 : index
    %c0_45 = arith.constant 0 : index
    %30 = vector.load %arg7[%c0_44, %c0_45] : memref<64x128xf32, #tpu.memory_space<vmem>>, vector<64x128xf32>
    %31 = arith.truncf %30 : vector<64x128xf32> to vector<64x128xbf16>
    %c0_46 = arith.constant 0 : index
    %c0_47 = arith.constant 0 : index
    %c0_48 = arith.constant 0 : index
    %32 = vector.load %arg4[%c0_46, %c0_47, %c0_48] : memref<1x64x128xbf16, #tpu.memory_space<vmem>>, vector<1x64x128xbf16>
    %33 = vector.shape_cast %32 : vector<1x64x128xbf16> to vector<64x128xbf16>
    %34 = vector.shape_cast %31 : vector<64x128xbf16> to vector<1x64x128xbf16>
    tpu.vector_store %arg4[%c0_46, %c0_47, %c0_48], %34 {strides = array<i32>} : memref<1x64x128xbf16, #tpu.memory_space<vmem>>, vector<1x64x128xbf16>,
    %cst_49 = arith.constant dense<0.000000e+00> : vector<128xf32>
    %35 = vector.multi_reduction <add>, %30, %cst_49 [0] : vector<64x128xf32> to vector<128xf32>
    %36 = vector.shape_cast %35 : vector<128xf32> to vector<1x128xf32>
    %c0_50 = arith.constant 0 : index
    %c0_51 = arith.constant 0 : index
    %c0_52 = arith.constant 0 : index
    %c0_53 = arith.constant 0 : index
    %37 = vector.load %arg5[%c0_50, %c0_51, %c0_52, %c0_53] : memref<1x1x1x128xf32, #tpu.memory_space<vmem>>, vector<1x1x1x128xf32>
    %38 = vector.shape_cast %37 : vector<1x1x1x128xf32> to vector<1x128xf32>
    %39 = vector.shape_cast %36 : vector<1x128xf32> to vector<1x1x1x128xf32>
    tpu.vector_store %arg5[%c0_50, %c0_51, %c0_52, %c0_53], %39 {strides = array<i32>} : memref<1x1x1x128xf32, #tpu.memory_space<vmem>>, vector<1x1x1x128xf32>,
    %40 = arith.mulf %30, %30 : vector<64x128xf32>
    %cst_54 = arith.constant dense<0.000000e+00> : vector<128xf32>
    %41 = vector.multi_reduction <add>, %40, %cst_54 [0] : vector<64x128xf32> to vector<128xf32>
    %42 = vector.shape_cast %41 : vector<128xf32> to vector<1x128xf32>
    %c0_55 = arith.constant 0 : index
    %c0_56 = arith.constant 0 : index
    %c0_57 = arith.constant 0 : index
    %c0_58 = arith.constant 0 : index
    %43 = vector.load %arg6[%c0_55, %c0_56, %c0_57, %c0_58] : memref<1x1x1x128xf32, #tpu.memory_space<vmem>>, vector<1x1x1x128xf32>
    %44 = vector.shape_cast %43 : vector<1x1x1x128xf32> to vector<1x128xf32>
    %45 = vector.shape_cast %42 : vector<1x128xf32> to vector<1x1x1x128xf32>
    tpu.vector_store %arg6[%c0_55, %c0_56, %c0_57, %c0_58], %45 {strides = array<i32>} : memref<1x1x1x128xf32, #tpu.memory_space<vmem>>, vector<1x1x1x128xf32>,
    return
  }
  func.func @transform_0(%arg0: i32, %arg1: i32) -> (i32, i32, i32, i32, i32) {
    %c0_i32 = arith.constant 0 : i32
    %c0_i32_0 = arith.constant 0 : i32
    %c0_i32_1 = arith.constant 0 : i32
    %c0_i32_2 = arith.constant 0 : i32
    return %arg0, %arg1, %c0_i32, %c0_i32_0, %c0_i32_1 : i32, i32, i32, i32, i32
  }
  func.func @transform_1(%arg0: i32, %arg1: i32) -> (i32, i32, i32) {
    %c0_i32 = arith.constant 0 : i32
    %c0_i32_0 = arith.constant 0 : i32
    %c0_i32_1 = arith.constant 0 : i32
    %c0_i32_2 = arith.constant 0 : i32
    return %c0_i32, %c0_i32_0, %c0_i32_1 : i32, i32, i32
  }
  func.func @transform_2(%arg0: i32, %arg1: i32) -> (i32, i32, i32) {
    %c0_i32 = arith.constant 0 : i32
    %c0_i32_0 = arith.constant 0 : i32
    return %arg0, %arg1, %c0_i32 : i32, i32, i32
  }
  func.func @transform_3(%arg0: i32, %arg1: i32) -> (i32, i32, i32, i32) {
    %c0_i32 = arith.constant 0 : i32
    %c0_i32_0 = arith.constant 0 : i32
    %c0_i32_1 = arith.constant 0 : i32
    return %arg0, %arg1, %c0_i32, %c0_i32_0 : i32, i32, i32, i32
  }
  func.func @transform_4(%arg0: i32, %arg1: i32) -> (i32, i32, i32, i32) {
    %c0_i32 = arith.constant 0 : i32
    %c0_i32_0 = arith.constant 0 : i32
    %c0_i32_1 = arith.constant 0 : i32
    return %arg0, %arg1, %c0_i32, %c0_i32_0 : i32, i32, i32, i32
  }
}

module attributes {stable_mosaic.version = 11 : i64} {
  func.func @_bn_lrelu_kernel(%arg0: i32, %arg1: i32, %arg2: memref<1x64x128xbf16, #tpu.memory_space<vmem>>, %arg3: memref<1x128xf32, #tpu.memory_space<vmem>>, %arg4: memref<1x128xf32, #tpu.memory_space<vmem>>, %arg5: memref<1x8x64xf32, #tpu.memory_space<vmem>>) attributes {dimension_semantics = [#tpu.dimension_semantics<parallel>, #tpu.dimension_semantics<parallel>], iteration_bounds = array<i64: 2, 1>, scalar_prefetch = 0 : i64, scratch_operands = 0 : i64, tpu.core_type = #tpu.core_type<tc>, window_params = [{transform_indices = @transform_0, window_bounds = array<i64: 1, 64, 128>}, {pipeline_mode = #tpu.pipeline_mode<synchronous>, transform_indices = @transform_1, window_bounds = array<i64: 1, 128>}, {pipeline_mode = #tpu.pipeline_mode<synchronous>, transform_indices = @transform_2, window_bounds = array<i64: 1, 128>}, {transform_indices = @transform_3, window_bounds = array<i64: 1, 8, 64>}]} {
    %c0 = arith.constant 0 : index
    %c0_0 = arith.constant 0 : index
    %c0_1 = arith.constant 0 : index
    %0 = vector.load %arg2[%c0, %c0_0, %c0_1] : memref<1x64x128xbf16, #tpu.memory_space<vmem>>, vector<1x64x128xbf16>
    %1 = vector.shape_cast %0 : vector<1x64x128xbf16> to vector<64x128xbf16>
    %2 = arith.extf %1 : vector<64x128xbf16> to vector<64x128xf32>
    %c0_2 = arith.constant 0 : index
    %c0_3 = arith.constant 0 : index
    %3 = vector.load %arg3[%c0_2, %c0_3] : memref<1x128xf32, #tpu.memory_space<vmem>>, vector<1x128xf32>
    %4 = vector.broadcast %3 : vector<1x128xf32> to vector<64x128xf32>
    %5 = arith.mulf %2, %4 : vector<64x128xf32>
    %c0_4 = arith.constant 0 : index
    %c0_5 = arith.constant 0 : index
    %6 = vector.load %arg4[%c0_4, %c0_5] : memref<1x128xf32, #tpu.memory_space<vmem>>, vector<1x128xf32>
    %7 = vector.broadcast %6 : vector<1x128xf32> to vector<64x128xf32>
    %8 = arith.addf %5, %7 : vector<64x128xf32>
    %cst = arith.constant 0.000000e+00 : f32
    %9 = vector.broadcast %cst : f32 to vector<64x128xf32>
    %10 = arith.cmpf oge, %8, %9 : vector<64x128xf32>
    %cst_6 = arith.constant 2.000000e-01 : f32
    %11 = vector.broadcast %cst_6 : f32 to vector<64x128xf32>
    %12 = arith.mulf %11, %8 : vector<64x128xf32>
    %13 = arith.select %10, %8, %12 : vector<64x128xi1>, vector<64x128xf32>
    %14 = tpu.transpose %13, [1, 0] : vector<64x128xf32> -> vector<128x64xf32>
    %15 = vector.extract_strided_slice %14 {offsets = [0, 0], sizes = [8, 64], strides = [1, 1]} : vector<128x64xf32> to vector<8x64xf32>
    %c0_7 = arith.constant 0 : index
    %c0_8 = arith.constant 0 : index
    %c0_9 = arith.constant 0 : index
    %16 = vector.load %arg5[%c0_7, %c0_8, %c0_9] : memref<1x8x64xf32, #tpu.memory_space<vmem>>, vector<1x8x64xf32>
    %17 = vector.shape_cast %16 : vector<1x8x64xf32> to vector<8x64xf32>
    %18 = vector.shape_cast %15 : vector<8x64xf32> to vector<1x8x64xf32>
    tpu.vector_store %arg5[%c0_7, %c0_8, %c0_9], %18 {strides = array<i32>} : memref<1x8x64xf32, #tpu.memory_space<vmem>>, vector<1x8x64xf32>,
    return
  }
  func.func @transform_0(%arg0: i32, %arg1: i32) -> (i32, i32, i32) {
    %c0_i32 = arith.constant 0 : i32
    %c0_i32_0 = arith.constant 0 : i32
    return %arg0, %arg1, %c0_i32 : i32, i32, i32
  }
  func.func @transform_1(%arg0: i32, %arg1: i32) -> (i32, i32) {
    %c0_i32 = arith.constant 0 : i32
    %c0_i32_0 = arith.constant 0 : i32
    %c0_i32_1 = arith.constant 0 : i32
    return %c0_i32, %c0_i32_0 : i32, i32
  }
  func.func @transform_2(%arg0: i32, %arg1: i32) -> (i32, i32) {
    %c0_i32 = arith.constant 0 : i32
    %c0_i32_0 = arith.constant 0 : i32
    %c0_i32_1 = arith.constant 0 : i32
    return %c0_i32, %c0_i32_0 : i32, i32
  }
  func.func @transform_3(%arg0: i32, %arg1: i32) -> (i32, i32, i32) {
    %c0_i32 = arith.constant 0 : i32
    %c0_i32_0 = arith.constant 0 : i32
    return %arg0, %c0_i32, %arg1 : i32, i32, i32
  }
}

</mosaic_0001>

<bundles_post_ra>
// kernel: cnn_block.3
= control target key start
LH: loop header
LB: loop body
LE: loop exit
PB: predicated region body
PF: predicated region fallthrough
CT: control target
= control target key end

     0   :  { %s487_s12 = smov 0   ;;  %s489_s13 = smov 0   ;;  %s530_s0 = inlined_call_operand.vmem [shape: bf16[2,64,128], index: 0, kind: input, shape index: {}]   ;;  %s531_s1 = inlined_call_operand.vmem [shape: f32[1,128], index: 1, kind: input, shape index: {}]   ;;  %s532_s2 = inlined_call_operand.vmem [shape: f32[1,128], index: 2, kind: input, shape index: {}]   ;;  %s533_s3 = inlined_call_operand.vmem [shape: f32[2,8,64], index: 3, kind: output, shape index: {}]  }
   0x1   :  { %s491_s14 = smov 0  }
   0x2 LB: > { %s25_s15 = sadd.s32 1, %s461_s13  ;;  %p390_p0 = scmp.ge.s32.totalorder %s465_s14, 1  ;;  %s465_s14 = sphi %s491_s14, %s13_s14   ;;  %s461_s13 = sphi %s489_s13, %s535_s13   ;;  %s457_s12 = sphi %s487_s12, %s534_s12  }
   0x3   : > { %p27_p1 = scmp.ge.s32.totalorder %s25_s15, 2  ;;  %p158_p2 = scmp.lt.s32.totalorder %s465_s14, 3 }
   0x5   : > { %s537_s15 = smov (%p27_p1, %s25_s15), 0  ;;  %p159_p3 = pnand %p390_p0, %p158_p2 }
   0x6   : > { %p189_p4 = scmp.lt.s32.totalorder (!%p159_p3), %s457_s12, 1  ;;  %v394_v1 = vld [vmem:[%s531_s1] ss:$0 sm:$0xff] (!%p159_p3)  ;;  %vm307_vm8 = vcmask (!%p159_p3), 523264  }
   0x7   : > { %162 = sbr.rel (%p159_p3) target bundleno = 157 (0x9d), region = 32  ;;  %v395_v6 = vld [vmem:[%s532_s2] ss:$0 sm:$0xff] (!%p159_p3) }
   0xe   : > { %s539_s12 = smov (!%p189_p4, %s457_s12), 1 }
   0xf   : > { %s398_s16 = sshll.u32 %s539_s12, 5  ;;  %s393_s24 = sshll.u32 %s539_s12, 3 }
  0x10   : > { %s196_s19 = scalar_lea.vmem %s530_s0, %s398_s16  ;;  %s204_s27 = scalar_lea.vmem %s533_s3, %s393_s24 }
  0x11   : > { %v400_v0 = vld [vmem:[%s196_s19] sm:$0xff]   ;;  %v415_v2 = vld [vmem:[%s196_s19 + $0x8] sm:$0xff]   ;;  %v416_v11 = vld [vmem:[%s196_s19 + $0x10] sm:$0xff]  }
  0x12   : > { %v401_v3 = vunpack.c.l.bf16 %v400_v0  ;;  %v402_v4 = vunpack.c.h.bf16 %v400_v0  ;;  %v405_v5 = vunpack.c.l.bf16 %v415_v2  ;;  %v406_v7 = vunpack.c.h.bf16 %v415_v2  ;;  %v417_v25 = vld [vmem:[%s196_s19 + $0x18] sm:$0xff]  }
  0x13   : > { %v409_v15 = vunpack.c.l.bf16 %v416_v11  ;;  %v410_v20 = vunpack.c.h.bf16 %v416_v11  ;;  %v413_v26 = vunpack.c.l.bf16 %v417_v25  ;;  %v414_v31 = vunpack.c.h.bf16 %v417_v25 }
  0x14   : > { %v228_v8 = vmul.f32 %v401_v3, %v394_v1  ;;  %v229_v9 = vmul.f32 %v402_v4, %v394_v1  ;;  %v230_v10 = vmul.f32 %v405_v5, %v394_v1  ;;  %v231_v14 = vmul.f32 %v406_v7, %v394_v1 }
  0x15   : > { %v232_v24 = vmul.f32 %v409_v15, %v394_v1  ;;  %v233_v30 = vmul.f32 %v410_v20, %v394_v1  ;;  %v234_v35 = vmul.f32 %v413_v26, %v394_v1  ;;  %v235_v39 = vmul.f32 %v414_v31, %v394_v1 }
  0x16   : > { %v243_v12 = vadd.f32 %v395_v6, %v228_v8  ;;  %v244_v13 = vadd.f32 %v395_v6, %v229_v9  ;;  %v245_v18 = vadd.f32 %v395_v6, %v230_v10  ;;  %v246_v23 = vadd.f32 %v395_v6, %v231_v14 }
  0x17   : > { %v247_v29 = vadd.f32 %v395_v6, %v232_v24  ;;  %v248_v34 = vadd.f32 %v395_v6, %v233_v30  ;;  %v249_v38 = vadd.f32 %v395_v6, %v234_v35  ;;  %v250_v42 = vadd.f32 %v395_v6, %v235_v39 }
  0x18   : > { %vm251_vm0 = vcmp.ge.f32.partialorder %v243_v12, 0.0  ;;  %v259_v16 = vmul.f32 0.2, %v243_v12  ;;  %v260_v17 = vmul.f32 0.2, %v244_v13  ;;  %vm252_vm1 = vcmp.ge.f32.partialorder %v244_v13, 0.0 }
  0x19   : > { %v261_v22 = vmul.f32 0.2, %v245_v18  ;;  %vm253_vm2 = vcmp.ge.f32.partialorder %v245_v18, 0.0  ;;  %v262_v28 = vmul.f32 0.2, %v246_v23  ;;  %vm254_vm3 = vcmp.ge.f32.partialorder %v246_v23, 0.0 }
  0x1a   : > { %v267_v19 = vsel %vm251_vm0, %v243_v12, %v259_v16  ;;  %v268_v21 = vsel %vm252_vm1, %v244_v13, %v260_v17  ;;  %v263_v33 = vmul.f32 0.2, %v247_v29  ;;  %vm255_vm4 = vcmp.ge.f32.partialorder %v247_v29, 0.0 }
  0x1b   : > { %275 = vxpose.xlu0.b32.start [1/8] (short) (narrow) %v267_v19, 8  ;;  %v269_v27 = vsel %vm253_vm2, %v245_v18, %v261_v22  ;;  %v270_v32 = vsel %vm254_vm3, %v246_v23, %v262_v28  ;;  %v264_v37 = vmul.f32 0.2, %v248_v34  ;;  %vm256_vm5 = vcmp.ge.f32.partialorder %v248_v34, 0.0 }
  0x1c   : > { %v271_v36 = vsel %vm255_vm4, %v247_v29, %v263_v33  ;;  %v265_v41 = vmul.f32 0.2, %v249_v38  ;;  %vm257_vm6 = vcmp.ge.f32.partialorder %v249_v38, 0.0  ;;  %v266_v44 = vmul.f32 0.2, %v250_v42 }
  0x1d   : > { %v272_v40 = vsel %vm256_vm5, %v248_v34, %v264_v37  ;;  %vm258_vm7 = vcmp.ge.f32.partialorder %v250_v42, 0.0 }
  0x1e   : > { %v273_v43 = vsel %vm257_vm6, %v249_v38, %v265_v41  ;;  %v274_v45 = vsel %vm258_vm7, %v250_v42, %v266_v44 }
  0x1f   : > { %276 = vxpose.xlu0.b32.cont [2/8] (short) (narrow) %v268_v21, 8 }
  0x23   : > { %277 = vxpose.xlu0.b32.cont [3/8] (short) (narrow) %v269_v27, 8 }
  0x27   : > { %278 = vxpose.xlu0.b32.cont [4/8] (short) (narrow) %v270_v32, 8 }
  0x2b   : > { %279 = vxpose.xlu0.b32.cont [5/8] (short) (narrow) %v271_v36, 8 }
  0x2f   : > { %280 = vxpose.xlu0.b32.cont [6/8] (short) (narrow) %v272_v40, 8 }
  0x33   : > { %281 = vxpose.xlu0.b32.cont [7/8] (short) (narrow) %v273_v43, 8 }
  0x37   : > { %282 = vxpose.xlu0.b32.end [8/8] (short) (narrow) %v274_v45, 8 }
  0x9b   : > { %v291_v46 = vpop.trf.xlu0 }
  0x9c   : > { %308 = vst.msk [vmem:[%s204_s27] sm:$0xff] %vm307_vm8, %v291_v46 }
  0x9d PF: > { %s13_s14 = sadd.s32 1, %s465_s14   ;;  %s534_s12 = smov %s461_s13 }
  0x9e   : > { %p10_p5 = scmp.ge.s32.totalorder %s13_s14, 4   ;;  %s535_s13 = smov %s537_s15 }
  0xa0   :  { %12 = sbr.rel (!%p10_p5) target bundleno = 2 (0x2), region = 62 }

// kernel: cnn_block.2
= control target key start
LH: loop header
LB: loop body
LE: loop exit
PB: predicated region body
PF: predicated region fallthrough
CT: control target
= control target key end

     0   :  { %s1336_s15 = smov 0   ;;  %s1338_s16 = smov 0   ;;  %s1433_s0 = inlined_call_operand.vmem [shape: bf16[2,1,2,72,16], index: 0, kind: input, shape index: {}]   ;;  %s1434_s1 = inlined_call_operand.vmem [shape: bf16[4,16,128], index: 1, kind: input, shape index: {}]   ;;  %s1435_s2 = inlined_call_operand.vmem [shape: bf16[2,64,128], index: 2, kind: output, shape index: {0}]   ;;  %s1436_s3 = inlined_call_operand.vmem [shape: f32[2,1,1,128], index: 3, kind: output, shape index: {1}]   ;;  %s1437_s4 = inlined_call_operand.vmem [shape: f32[2,1,1,128], index: 4, kind: output, shape index: {2}]  }
   0x1   :  { %s1340_s17 = smov 0  }
   0x2 LB: > { %s27_s18 = sadd.s32 1, %s1305_s16  ;;  %p1054_p0 = scmp.ge.s32.totalorder %s1309_s17, 1  ;;  %s1309_s17 = sphi %s1340_s17, %s15_s17   ;;  %s1305_s16 = sphi %s1338_s16, %s1439_s16   ;;  %s1301_s15 = sphi %s1336_s15, %s1438_s15  }
   0x3   : > { %p29_p1 = scmp.ge.s32.totalorder %s27_s18, 2  ;;  %p191_p2 = scmp.lt.s32.totalorder %s1309_s17, 3 }
   0x5   : > { %s1441_s18 = smov (%p29_p1, %s27_s18), 0  ;;  %p192_p3 = pnand %p1054_p0, %p191_p2 }
   0x6   : > { %v1267_v0 = vld [vmem:[%s1434_s1] sm:$0xff] (!%p192_p3)   ;;  %p237_p4 = scmp.lt.s32.totalorder (!%p192_p3), %s1301_s15, 1  ;;  %v1268_v1 = vld [vmem:[%s1434_s1 + $0x10] sm:$0xff] (!%p192_p3)   ;;  %v1270_v2 = vld [vmem:[%s1434_s1 + $0x8] sm:$0xff] (!%p192_p3)   ;;  %vm305_vm0 = vcmask (!%p192_p3), 130048  }
   0x7   : > { %195 = sbr.rel (%p192_p3) target bundleno = 283 (0x11b), region = 28  ;;  %1178 = vmatprep.subr.bf16.mxu1 (!%p192_p3), %v1267_v0  ;;  %1198 = vmatprep.subr.bf16.mxu0 (!%p192_p3), %v1268_v1  ;;  %v1272_v3 = vld [vmem:[%s1434_s1 + $0x18] sm:$0xff] (!%p192_p3)  }
   0x8   : > { %1179 = vmatpush3.bf16.msra.mxu1 (!%p192_p3), %v1267_v0  ;;  %1199 = vmatpush3.bf16.msra.mxu0 (!%p192_p3), %v1268_v1 }
   0x9   : > { %1188 = vmatprep.subr.bf16.mxu1 (!%p192_p3), %v1270_v2  ;;  %1208 = vmatprep.subr.bf16.mxu0 (!%p192_p3), %v1272_v3 }
   0xe   : > { %s1443_s15 = smov (!%p237_p4, %s1301_s15), 1 }
   0xf   : > { %s1242_s27 = smul.u32 72, %s1443_s15  ;;  %s1126_s5 = sshll.u32 %s1443_s15, 5 }
  0x10   : > { %s1410_s8 = scalar_lea.vmem %s1435_s2, %s1126_s5  ;;  %s261_s11 = scalar_lea.vmem %s1436_s3, %s1443_s15 }
  0x11   : > { %s1372_s30 = scalar_lea.vmem %s1433_s0, %s1242_s27  ;;  %s267_s14 = scalar_lea.vmem %s1437_s4, %s1443_s15 }
  0x12   : > { %v1269_v4 = vld [vmem:[%s1372_s30] sm:$0xff]   ;;  %v1273_v6 = vld [vmem:[%s1372_s30 + $0x8] sm:$0xff]   ;;  %v1275_v8 = vld [vmem:[%s1372_s30 + $0x10] sm:$0xff]  }
  0x13   : > { %v1271_v5 = vld [vmem:[%s1372_s30 + $0x24] sm:$0xff]   ;;  %1180 = vmatprep.mubr.msk.bf16.mxu1 %vm305_vm0, %v1269_v4  ;;  %v1274_v7 = vld [vmem:[%s1372_s30 + $0x2c] sm:$0xff]   ;;  %v1276_v9 = vld [vmem:[%s1372_s30 + $0x34] sm:$0xff]  }
  0x14   : > { %1200 = vmatprep.mubr.msk.bf16.mxu0 %vm305_vm0, %v1271_v5  ;;  %1181 = vmatmul.mubr.msk.bf16.vlgmr.msra.gmra.mrb[0].mxu1 %vm305_vm0, %v1273_v6  ;;  %v1277_v10 = vld [vmem:[%s1372_s30 + $0x18] sm:$0xff]   ;;  %v1279_v12 = vld [vmem:[%s1372_s30 + $0x4] sm:$0xff]   ;;  %v1281_v14 = vld [vmem:[%s1372_s30 + $0xc] sm:$0xff]  }
  0x15   : > { %1189 = vmatpush3.bf16.msra.mxu1 %v1270_v2  ;;  %1201 = vmatmul.mubr.msk.bf16.vlgmr.msra.gmra.mrb[0].mxu0 %vm305_vm0, %v1274_v7  ;;  %v1278_v11 = vld [vmem:[%s1372_s30 + $0x3c] sm:$0xff]   ;;  %v1280_v13 = vld [vmem:[%s1372_s30 + $0x28] sm:$0xff]   ;;  %v1282_v15 = vld [vmem:[%s1372_s30 + $0x30] sm:$0xff]  }
  0x16   : > { %1209 = vmatpush3.bf16.msra.mxu0 %v1272_v3  ;;  %1184 = vmatprep.mubr.msk.bf16.mxu1 %vm305_vm0, %v1275_v8  ;;  %v1283_v16 = vld [vmem:[%s1372_s30 + $0x14] sm:$0xff]   ;;  %v1285_v18 = vld [vmem:[%s1372_s30 + $0x1c] sm:$0xff]  }
  0x17   : > { %1204 = vmatprep.mubr.msk.bf16.mxu0 %vm305_vm0, %v1276_v9  ;;  %v1284_v17 = vld [vmem:[%s1372_s30 + $0x38] sm:$0xff]   ;;  %v1286_v19 = vld [vmem:[%s1372_s30 + $0x40] sm:$0xff]  }
  0x1c   : > { %1185 = vmatmul.mubr.msk.bf16.gmra.mrb[4].mxu1 %vm305_vm0, %v1277_v10 }
  0x1d   : > { %1205 = vmatmul.mubr.msk.bf16.gmra.mrb[4].mxu0 %vm305_vm0, %v1278_v11  ;;  %1190 = vmatprep.mubr.msk.bf16.mxu1 %vm305_vm0, %v1279_v12 }
  0x1e   : > { %1210 = vmatprep.mubr.msk.bf16.mxu0 %vm305_vm0, %v1280_v13 }
  0x24   : > { %1191 = vmatmul.mubr.msk.bf16.vlgmr.msra.gmra.mrb[0].mxu1 %vm305_vm0, %v1281_v14 }
  0x25   : > { %1211 = vmatmul.mubr.msk.bf16.vlgmr.msra.gmra.mrb[0].mxu0 %vm305_vm0, %v1282_v15  ;;  %1194 = vmatprep.mubr.msk.bf16.mxu1 %vm305_vm0, %v1283_v16 }
  0x26   : > { %1214 = vmatprep.mubr.msk.bf16.mxu0 %vm305_vm0, %v1284_v17 }
  0x2c   : > { %1195 = vmatmul.mubr.msk.bf16.gmra.mrb[4].mxu1 %vm305_vm0, %v1285_v18 }
  0x2d   : > { %1215 = vmatmul.mubr.msk.bf16.gmra.mrb[4].mxu0 %vm305_vm0, %v1286_v19 }
  0xf7   : > { %v1192_v20 = vpop.f32.mrb[0].mxu1 }
  0xf8   : > { %v1212_v21 = vpop.f32.mrb[0].mxu0  ;;  %v474_v22 = vpop.f32.mrb[1].mxu1 }
  0xf9   : > { %v1218_v23 = vadd.f32 %v1212_v21, %v1192_v20  ;;  %v751_v24 = vpop.f32.mrb[1].mxu0  ;;  %v1193_v25 = vpop.f32.mrb[2].mxu1 }
  0xfa   : > { %v1219_v26 = vadd.f32 %v751_v24, %v474_v22  ;;  %v1213_v27 = vpop.f32.mrb[2].mxu0  ;;  %v477_v28 = vpop.f32.mrb[3].mxu1 }
  0xfb   : > { %v1220_v29 = vadd.f32 %v1213_v27, %v1193_v25  ;;  %v754_v30 = vpop.f32.mrb[3].mxu0  ;;  %v870_v38 = vmul.f32 %v1218_v23, %v1218_v23 }
  0xfc   : > { %v1221_v31 = vadd.f32 %v754_v30, %v477_v28  ;;  %v868_v33 = vmul.f32 %v1219_v26, %v1219_v26 }
  0xfd   : > { %v1143_v32 = vpack.c.bf16 %v1220_v29, %v1218_v23  ;;  %v871_v46 = vmul.f32 %v1220_v29, %v1220_v29 }
  0xfe   : > { %v1138_v34 = vpack.c.bf16 %v1221_v31, %v1219_v26  ;;  %v854_v35 = vadd.f32 %v1221_v31, %v1219_v26  ;;  %v869_v36 = vmul.f32 %v1221_v31, %v1221_v31 }
  0xff   : > { %1155 = vst [vmem:[%s1410_s8 + $0x8] sm:$0xff] %v1143_v32   ;;  %v1196_v37 = vpop.f32.mrb[4].mxu1 }
 0x100   : > { %1139 = vst [vmem:[%s1410_s8] sm:$0xff] %v1138_v34   ;;  %v855_v39 = vadd.f32 %v1218_v23, %v854_v35  ;;  %v876_v40 = vadd.f32 %v869_v36, %v868_v33  ;;  %v1216_v41 = vpop.f32.mrb[4].mxu0  ;;  %v490_v42 = vpop.f32.mrb[5].mxu1 }
 0x101   : > { %v1222_v43 = vadd.f32 %v1216_v41, %v1196_v37  ;;  %v767_v44 = vpop.f32.mrb[5].mxu0  ;;  %v1197_v45 = vpop.f32.mrb[6].mxu1 }
 0x102   : > { %v877_v47 = vadd.f32 %v876_v40, %v870_v38  ;;  %v1223_v48 = vadd.f32 %v767_v44, %v490_v42  ;;  %v856_v49 = vadd.f32 %v1220_v29, %v855_v39  ;;  %v1217_v50 = vpop.f32.mrb[6].mxu0  ;;  %v493_v51 = vpop.f32.mrb[7].mxu1 }
 0x103   : > { %v1224_v52 = vadd.f32 %v1217_v50, %v1197_v45  ;;  %v770_v53 = vpop.f32.mrb[7].mxu0  ;;  %v874_v63 = vmul.f32 %v1222_v43, %v1222_v43 }
 0x104   : > { %v857_v54 = vadd.f32 %v1223_v48, %v856_v49  ;;  %v872_v55 = vmul.f32 %v1223_v48, %v1223_v48  ;;  %v878_v56 = vadd.f32 %v877_v47, %v871_v46  ;;  %v1225_v57 = vadd.f32 %v770_v53, %v493_v51 }
 0x105   : > { %v1153_v58 = vpack.c.bf16 %v1224_v52, %v1222_v43  ;;  %v875_v2 = vmul.f32 %v1224_v52, %v1224_v52 }
 0x106   : > { %v879_v59 = vadd.f32 %v878_v56, %v872_v55  ;;  %v1148_v60 = vpack.c.bf16 %v1225_v57, %v1223_v48  ;;  %v858_v61 = vadd.f32 %v1225_v57, %v857_v54  ;;  %v873_v62 = vmul.f32 %v1225_v57, %v1225_v57 }
 0x107   : > { %1157 = vst [vmem:[%s1410_s8 + $0x18] sm:$0xff] %v1153_v58  }
 0x108   : > { %1156 = vst [vmem:[%s1410_s8 + $0x10] sm:$0xff] %v1148_v60   ;;  %v859_v0 = vadd.f32 %v1222_v43, %v858_v61  ;;  %v880_v1 = vadd.f32 %v879_v59, %v873_v62 }
 0x10a   : > { %v860_v3 = vadd.f32 %v1224_v52, %v859_v0  ;;  %v881_v4 = vadd.f32 %v880_v1, %v874_v63 }
 0x10c   : > { %v861_v5 = vrot.slane %v860_v3, 4  ;;  %v882_v6 = vadd.f32 %v881_v4, %v875_v2 }
 0x10e   : > { %v862_v7 = vadd.f32 %v861_v5, %v860_v3  ;;  %v883_v8 = vrot.slane %v882_v6, 4 }
 0x110   : > { %v863_v9 = vrot.slane %v862_v7, 2  ;;  %v884_v10 = vadd.f32 %v883_v8, %v882_v6 }
 0x112   : > { %v864_v11 = vadd.f32 %v863_v9, %v862_v7  ;;  %v885_v12 = vrot.slane %v884_v10, 2 }
 0x114   : > { %v865_v13 = vrot.slane %v864_v11, 1  ;;  %v886_v14 = vadd.f32 %v885_v12, %v884_v10 }
 0x116   : > { %v866_v15 = vadd.f32 %v865_v13, %v864_v11  ;;  %v887_v16 = vrot.slane %v886_v14, 1 }
 0x118   : > { %867 = vst [vmem:[%s261_s11] sm:$0x1] %v866_v15  ;;  %v888_v17 = vadd.f32 %v887_v16, %v886_v14 }
 0x11a   : > { %889 = vst [vmem:[%s267_s14] sm:$0x1] %v888_v17 }
 0x11b PF: > { %s15_s17 = sadd.s32 1, %s1309_s17   ;;  %s1438_s15 = smov %s1305_s16 }
 0x11c   : > { %p12_p5 = scmp.ge.s32.totalorder %s15_s17, 4   ;;  %s1439_s16 = smov %s1441_s18 }
 0x11e   :  { %14 = sbr.rel (!%p12_p5) target bundleno = 2 (0x2), region = 86 }

</bundles_post_ra>
